<compile_context>
chip_gen: v7x
topology: tpu7x:2x2x1
jax: 0.10.0
libtpu: 0.0.40
codegen_flags: <defaults>
</compile_context>

<pallas_src>
import jax
import jax.numpy as jnp
from jax.experimental import pallas as pl
from jax.experimental.pallas import tpu as pltpu

_SUB, _LANE = 8, 128


def _round_up(x, m):
    return (x + m - 1) // m * m


def _mlp_kernel(x_ref, w1_ref, b1_ref, w2_ref, b2_ref, out_ref):
    """One batch tile of: out = relu(x @ W1 + b1) @ W2 + b2.

    Both matmuls hit the MXU with f32 accumulation; bias add + ReLU run in f32
    on the VPU.  x arrives in its HBM dtype and is cast to the weight dtype
    in-kernel (no extra HBM pass over the activations).
    """
    x = x_ref[...]                                        # (TB, D_in)
    if x.dtype != w1_ref.dtype:
        x = x.astype(w1_ref.dtype)                        # in-VMEM cast for MXU
    h = jnp.dot(x, w1_ref[...], preferred_element_type=jnp.float32)
    h = jnp.maximum(h + b1_ref[...], 0.0)                 # f32 bias + ReLU
    if h.dtype != w2_ref.dtype:
        h = h.astype(w2_ref.dtype)                        # feed 2nd MXU pass
    y = jnp.dot(h, w2_ref[...], preferred_element_type=jnp.float32)
    out_ref[...] = (y + b2_ref[...]).astype(out_ref.dtype)


def standalone_learning_module(x, w1, b1, w2, b2, *, use_bf16_mxu=True,
                               batch_tile=None):
    """Fused MLP forward via a batch-blocked Pallas kernel.

    x : (B, input_size)            float32
    w1: (input_size, hidden)       float32  (transposed vs PyTorch Linear.weight)
    b1: (hidden,) or (1, hidden)   float32
    w2: (hidden, num_classes)      float32
    b2: (num_classes,) or (1, num_classes) float32
    returns: (B, num_classes) float32 logits

    use_bf16_mxu (default True): cast W1/W2 (wrapper) and x/h (in-kernel) to
    bf16 for the MXU — native fast path on v5e/v6e/v7x — keeping f32
    accumulation and f32 bias/ReLU.  Set False for an exact f32 forward.
    """
    B, d_in = x.shape
    hidden = w1.shape[1]
    num_classes = w2.shape[1]
    b1 = jnp.reshape(b1, (1, hidden))
    b2 = jnp.reshape(b2, (1, num_classes))

    h_pad = _round_up(hidden, _LANE)        # lane-dense hidden
    c_pad = _round_up(num_classes, _LANE)   # lane-dense logits (unmasked vst)

    # ---- batch tile selection --------------------------------------------
    if batch_tile is None:
        if B >= 16:
            # Big tiles amortize the ~0.35 µs per-grid-step overhead, but keep
            # at least two grid steps so v7x's two TensorCores both get a tile.
            batch_tile = min(1024, _round_up(pl.cdiv(B, 2), _SUB))
        else:
            batch_tile = _SUB
    # Guard user-supplied tiles: sublane multiple, no more than one tile over B.
    tb = max(_SUB, _round_up(int(batch_tile), _SUB))
    tb = min(tb, _round_up(B, _SUB))
    num_tiles = pl.cdiv(B, tb)              # partial last tile is masked

    mxu_dtype = jnp.bfloat16 if use_bf16_mxu else jnp.float32

    def pad2(a, rows, cols, dtype):
        a = a.astype(dtype)
        return jnp.pad(a, ((0, rows - a.shape[0]), (0, cols - a.shape[1])))

    # Weights are small one-time copies; x is deliberately left untouched.
    w1p = pad2(w1, d_in, h_pad, mxu_dtype)
    w2p = pad2(w2, h_pad, c_pad, mxu_dtype)
    b1p = pad2(b1, 1, h_pad, jnp.float32)   # biases stay f32 on the VPU
    b2p = pad2(b2, 1, c_pad, jnp.float32)

    flops = 2 * B * d_in * h_pad + 2 * B * h_pad * c_pad
    bytes_accessed = int(
        x.size * x.dtype.itemsize
        + w1p.size * w1p.dtype.itemsize
        + w2p.size * w2p.dtype.itemsize
        + (b1p.size + b2p.size) * 4
        + B * c_pad * 4)

    out_padded = pl.pallas_call(
        _mlp_kernel,
        out_shape=jax.ShapeDtypeStruct((B, c_pad), jnp.float32),
        grid_spec=pltpu.PrefetchScalarGridSpec(
            num_scalar_prefetch=0,
            grid=(num_tiles,),
            in_specs=[
                pl.BlockSpec((tb, d_in), lambda i: (i, 0)),      # x: batch-tiled
                pl.BlockSpec((d_in, h_pad), lambda i: (0, 0)),   # W1: resident
                pl.BlockSpec((1, h_pad), lambda i: (0, 0)),      # b1: resident
                pl.BlockSpec((h_pad, c_pad), lambda i: (0, 0)),  # W2: resident
                pl.BlockSpec((1, c_pad), lambda i: (0, 0)),      # b2: resident
            ],
            out_specs=pl.BlockSpec((tb, c_pad), lambda i: (i, 0)),
        ),
        compiler_params=pltpu.CompilerParams(
            dimension_semantics=("parallel",),   # shard batch tiles across TCs
        ),
        cost_estimate=pl.CostEstimate(
            flops=flops, transcendentals=0, bytes_accessed=bytes_accessed),
    )(x, w1p, b1p, w2p, b2p)

    # Only the class padding needs slicing (batch is not padded anymore).
    return out_padded[:, :num_classes]


def reference_mlp(x, w1, b1, w2, b2):
    """Pure-JAX reference of the PyTorch forward pass."""
    h = jnp.maximum(x @ jnp.asarray(w1) + jnp.reshape(b1, (1, -1)), 0.0)
    return h @ jnp.asarray(w2) + jnp.reshape(b2, (1, -1))


if __name__ == "__main__":
    # Small shapes consistent with the module's forward:
    #   input_size=32, hidden_layers=[64], num_classes=10, batch=8
    B, D_IN, HIDDEN, NUM_CLASSES = 8, 32, 64, 10

    key = jax.random.PRNGKey(0)
    kx, kw1, kb1, kw2, kb2 = jax.random.split(key, 5)

    x = jax.random.normal(kx, (B, D_IN), dtype=jnp.float32)

    # Deterministic parameter init (PyTorch-Linear-style uniform bounds).
    bound1 = 1.0 / jnp.sqrt(D_IN)
    w1 = jax.random.uniform(kw1, (D_IN, HIDDEN), jnp.float32, -bound1, bound1)
    b1 = jax.random.uniform(kb1, (1, HIDDEN), jnp.float32, -bound1, bound1)

    bound2 = 1.0 / jnp.sqrt(HIDDEN)
    w2 = jax.random.uniform(kw2, (HIDDEN, NUM_CLASSES), jnp.float32, -bound2, bound2)
    b2 = jax.random.uniform(kb2, (1, NUM_CLASSES), jnp.float32, -bound2, bound2)

    ref = reference_mlp(x, w1, b1, w2, b2)

    # Default path: bf16 MXU inputs (fast on v5e/v6e/v7x), f32 accumulation.
    out = jax.block_until_ready(standalone_learning_module(x, w1, b1, w2, b2))
    assert out.shape == (B, NUM_CLASSES)
    assert jnp.allclose(out, ref, atol=1e-1, rtol=5e-2)

    # Exact f32 path.
    out_f32 = jax.block_until_ready(
        standalone_learning_module(x, w1, b1, w2, b2, use_bf16_mxu=False))
    assert out_f32.shape == (B, NUM_CLASSES)
    assert jnp.allclose(out_f32, ref, atol=1e-5, rtol=1e-5)

    # Larger batch that does NOT divide the tile: exercises the cdiv grid with
    # a masked partial last block and the >=2-step grid used by v7x megacore.
    B2 = 200
    x2 = jax.random.normal(jax.random.PRNGKey(1), (B2, D_IN), dtype=jnp.float32)
    ref2 = reference_mlp(x2, w1, b1, w2, b2)
    out2 = jax.block_until_ready(standalone_learning_module(x2, w1, b1, w2, b2))
    assert out2.shape == (B2, NUM_CLASSES)
    assert jnp.allclose(out2, ref2, atol=1e-1, rtol=5e-2)

    print("KERNEL_OK")
</pallas_src>

<mosaic_0001>
module attributes {stable_mosaic.version = 11 : i64} {
  func.func @_mlp_kernel(%arg0: i32, %arg1: memref<8x32xf32, #tpu.memory_space<vmem>>, %arg2: memref<32x128xbf16, #tpu.memory_space<vmem>>, %arg3: memref<1x128xf32, #tpu.memory_space<vmem>>, %arg4: memref<128x128xbf16, #tpu.memory_space<vmem>>, %arg5: memref<1x128xf32, #tpu.memory_space<vmem>>, %arg6: memref<8x128xf32, #tpu.memory_space<vmem>>) attributes {dimension_semantics = [#tpu.dimension_semantics<parallel>], iteration_bounds = array<i64: 1>, scalar_prefetch = 0 : i64, scratch_operands = 0 : i64, tpu.core_type = #tpu.core_type<tc>, window_params = [{transform_indices = @transform_0, window_bounds = array<i64: 8, 32>}, {pipeline_mode = #tpu.pipeline_mode<synchronous>, transform_indices = @transform_1, window_bounds = array<i64: 32, 128>}, {pipeline_mode = #tpu.pipeline_mode<synchronous>, transform_indices = @transform_2, window_bounds = array<i64: 1, 128>}, {pipeline_mode = #tpu.pipeline_mode<synchronous>, transform_indices = @transform_3, window_bounds = array<i64: 128, 128>}, {pipeline_mode = #tpu.pipeline_mode<synchronous>, transform_indices = @transform_4, window_bounds = array<i64: 1, 128>}, {transform_indices = @transform_5, window_bounds = array<i64: 8, 128>}]} {
    %c0 = arith.constant 0 : index
    %c0_0 = arith.constant 0 : index
    %0 = vector.load %arg1[%c0, %c0_0] : memref<8x32xf32, #tpu.memory_space<vmem>>, vector<8x32xf32>
    %1 = arith.truncf %0 : vector<8x32xf32> to vector<8x32xbf16>
    %c0_1 = arith.constant 0 : index
    %c0_2 = arith.constant 0 : index
    %2 = vector.load %arg2[%c0_1, %c0_2] : memref<32x128xbf16, #tpu.memory_space<vmem>>, vector<32x128xbf16>
    %cst = arith.constant dense<0.000000e+00> : vector<8x128xf32>
    %3 = tpu.matmul %1, %2, %cst {dimension_numbers = #tpu.dot_dimension_numbers<[1], [0], [0], [1], [0, 0, 1, 1], [], []>} : vector<8x32xbf16>, vector<32x128xbf16>, vector<8x128xf32> -> vector<8x128xf32>
    %c0_3 = arith.constant 0 : index
    %c0_4 = arith.constant 0 : index
    %4 = vector.load %arg3[%c0_3, %c0_4] : memref<1x128xf32, #tpu.memory_space<vmem>>, vector<1x128xf32>
    %5 = vector.broadcast %4 : vector<1x128xf32> to vector<8x128xf32>
    %6 = arith.addf %3, %5 : vector<8x128xf32>
    %cst_5 = arith.constant 0.000000e+00 : f32
    %7 = vector.broadcast %cst_5 : f32 to vector<8x128xf32>
    %8 = arith.maximumf %6, %7 : vector<8x128xf32>
    %9 = arith.truncf %8 : vector<8x128xf32> to vector<8x128xbf16>
    %c0_6 = arith.constant 0 : index
    %c0_7 = arith.constant 0 : index
    %10 = vector.load %arg4[%c0_6, %c0_7] : memref<128x128xbf16, #tpu.memory_space<vmem>>, vector<128x128xbf16>
    %cst_8 = arith.constant dense<0.000000e+00> : vector<8x128xf32>
    %11 = tpu.matmul %9, %10, %cst_8 {dimension_numbers = #tpu.dot_dimension_numbers<[1], [0], [0], [1], [0, 0, 1, 1], [], []>} : vector<8x128xbf16>, vector<128x128xbf16>, vector<8x128xf32> -> vector<8x128xf32>
    %c0_9 = arith.constant 0 : index
    %c0_10 = arith.constant 0 : index
    %12 = vector.load %arg5[%c0_9, %c0_10] : memref<1x128xf32, #tpu.memory_space<vmem>>, vector<1x128xf32>
    %13 = vector.broadcast %12 : vector<1x128xf32> to vector<8x128xf32>
    %14 = arith.addf %11, %13 : vector<8x128xf32>
    %c0_11 = arith.constant 0 : index
    %c0_12 = arith.constant 0 : index
    %15 = vector.load %arg6[%c0_11, %c0_12] : memref<8x128xf32, #tpu.memory_space<vmem>>, vector<8x128xf32>
    tpu.vector_store %arg6[%c0_11, %c0_12], %14 {strides = array<i32>} : memref<8x128xf32, #tpu.memory_space<vmem>>, vector<8x128xf32>,
    return
  }
  func.func @transform_0(%arg0: i32) -> (i32, i32) {
    %c0_i32 = arith.constant 0 : i32
    %c0_i32_0 = arith.constant 0 : i32
    return %arg0, %c0_i32 : i32, i32
  }
  func.func @transform_1(%arg0: i32) -> (i32, i32) {
    %c0_i32 = arith.constant 0 : i32
    %c0_i32_0 = arith.constant 0 : i32
    %c0_i32_1 = arith.constant 0 : i32
    return %c0_i32, %c0_i32_0 : i32, i32
  }
  func.func @transform_2(%arg0: i32) -> (i32, i32) {
    %c0_i32 = arith.constant 0 : i32
    %c0_i32_0 = arith.constant 0 : i32
    %c0_i32_1 = arith.constant 0 : i32
    return %c0_i32, %c0_i32_0 : i32, i32
  }
  func.func @transform_3(%arg0: i32) -> (i32, i32) {
    %c0_i32 = arith.constant 0 : i32
    %c0_i32_0 = arith.constant 0 : i32
    %c0_i32_1 = arith.constant 0 : i32
    return %c0_i32, %c0_i32_0 : i32, i32
  }
  func.func @transform_4(%arg0: i32) -> (i32, i32) {
    %c0_i32 = arith.constant 0 : i32
    %c0_i32_0 = arith.constant 0 : i32
    %c0_i32_1 = arith.constant 0 : i32
    return %c0_i32, %c0_i32_0 : i32, i32
  }
  func.func @transform_5(%arg0: i32) -> (i32, i32) {
    %c0_i32 = arith.constant 0 : i32
    %c0_i32_0 = arith.constant 0 : i32
    return %arg0, %c0_i32 : i32, i32
  }
}

</mosaic_0001>

<bundles_post_ra>
// kernel: tpu_custom_call.1
= control target key start
LH: loop header
LB: loop body
LE: loop exit
PB: predicated region body
PF: predicated region fallthrough
CT: control target
= control target key end

     0   :  { %10 = vsyncpa [#allocation3], 0  ;;  %s523_s0 = inlined_call_operand.hbm [shape: f32[8,32], index: 0, kind: input, shape index: {}]   ;;  %s524_s1 = inlined_call_operand.hbm [shape: bf16[32,128], index: 1, kind: input, shape index: {}]   ;;  %s525_s2 = inlined_call_operand.vmem [shape: f32[1,128], index: 2, kind: input, shape index: {}]   ;;  %s526_s3 = inlined_call_operand.hbm [shape: bf16[128,128], index: 3, kind: input, shape index: {}]   ;;  %s527_s4 = inlined_call_operand.vmem [shape: f32[1,128], index: 4, kind: input, shape index: {}]   ;;  %s528_s5 = inlined_call_operand.hbm [shape: f32[8,128], index: 5, kind: output, shape index: {}]  }
   0x1   :  { %11 = vsyncpa [#allocation6], 0 }
   0x2   :  { %12 = vsyncpa [#allocation4], 0  ;;  %s425_s18 = smov [#allocation5]   ;;  %s331_s22 = scalar_lea.hbm %s524_s1, 256 }
   0x3   :  { %s28_s19 = sshll.u32 %s425_s18, 4  ;;  %p332_p0 = scmp.ne.s32.totalorder %s524_s1, %s331_s22  ;;  %s29_s19 = int_to_ptr.vmem [resolvable:$true] %s28_s19 }
   0x4   :  { %p335_p1 = scmp.lt.u32.totalorder %s331_s22, %s524_s1 }
   0x6   :  { %p337_p2 = pnand %p335_p1, %p332_p0 }
   0x8   :  { %340 = shalt.err (!%p337_p2)
}
   0x9   :  { %s341_s27 = scalar_lea.vmem %s29_s19, 256  ;;  %p346_p4 = scmp.lt.s32.totalorder %s29_s19, %s29_s19 }
   0xa   :  { %p342_p3 = scmp.ne.s32.totalorder %s29_s19, %s341_s27  ;;  %p347_p5 = scmp.lt.s32.totalorder %s341_s27, %s341_s27 }
   0xc   :  { %p348_p6 = por %p347_p5, %p346_p4 }
   0xe   :  { %p349_p7 = pnand %p348_p6, %p342_p3 }
  0x10   :  { %352 = shalt.err (!%p349_p7)
}
  0x11   :  { %s426_s28 = smov 64   ;;  %s427_s29 = smov 4  }
  0x12   :  { %34 = dma.hbm_to_vmem [thread:$0]  %s524_s1, 256, %s29_s19, [#allocation6], %s426_s28, %s426_s28, %s427_s29  }
  0x13   :  { %s428_s7 = smov [#allocation2]   ;;  %s429_s9 = smov [#allocation7]  }
  0x14   :  { %s19_s8 = sshll.u32 %s428_s7, 4  ;;  %s42_s10 = sshll.u32 %s429_s9, 4  ;;  %s20_s8 = int_to_ptr.vmem [resolvable:$true] %s19_s8  ;;  %s43_s10 = int_to_ptr.vmem [resolvable:$true] %s42_s10 }
  0x15   :  { %s353_s13 = scalar_lea.hbm %s523_s0, 128 }
  0x16   :  { %p354_p8 = scmp.ne.s32.totalorder %s523_s0, %s353_s13  ;;  %p357_p9 = scmp.lt.u32.totalorder %s353_s13, %s523_s0 }
  0x18   :  { %p359_p10 = pnand %p357_p9, %p354_p8 }
  0x1a   :  { %362 = shalt.err (!%p359_p10)
}
  0x1b   :  { %s363_s1 = scalar_lea.vmem %s20_s8, 128  ;;  %p368_p12 = scmp.lt.s32.totalorder %s20_s8, %s20_s8 }
  0x1c   :  { %p364_p11 = scmp.ne.s32.totalorder %s20_s8, %s363_s1  ;;  %p369_p13 = scmp.lt.s32.totalorder %s363_s1, %s363_s1 }
  0x1e   :  { %p370_p0 = por %p369_p13, %p368_p12 }
  0x20   :  { %p371_p1 = pnand %p370_p0, %p364_p11 }
  0x22   :  { %374 = shalt.err (!%p371_p1)
}
  0x23   :  { %22 = dma.hbm_to_vmem [thread:$0]  %s523_s0, 128, %s20_s8, [#allocation3]  }
  0x24   :  { %s375_s22 = scalar_lea.hbm %s526_s3, 1024 }
  0x25   :  { %p376_p2 = scmp.ne.s32.totalorder %s526_s3, %s375_s22  ;;  %p379_p3 = scmp.lt.u32.totalorder %s375_s22, %s526_s3 }
  0x27   :  { %p381_p4 = pnand %p379_p3, %p376_p2 }
  0x29   :  { %384 = shalt.err (!%p381_p4)
}
  0x2a   :  { %s385_s27 = scalar_lea.vmem %s43_s10, 1024  ;;  %p390_p6 = scmp.lt.s32.totalorder %s43_s10, %s43_s10 }
  0x2b   :  { %p386_p5 = scmp.ne.s32.totalorder %s43_s10, %s385_s27  ;;  %p391_p7 = scmp.lt.s32.totalorder %s385_s27, %s385_s27 }
  0x2d   :  { %p392_p8 = por %p391_p7, %p390_p6 }
  0x2f   :  { %p393_p9 = pnand %p392_p8, %p386_p5 }
  0x31   :  { %396 = shalt.err (!%p393_p9)
}
  0x32   :  { %48 = dma.hbm_to_vmem [thread:$0]  %s526_s3, 1024, %s43_s10, [#allocation6], %s426_s28, %s426_s28, %s427_s29  }
  0x33   :  { %419 = dma.done.wait [#allocation3], 128  }
  0x34   :  { %420 = vsyncadd [#allocation3], 4294967168 }
  0x35   :  { %421 = dma.done.wait [#allocation6], 1280  }
  0x36   :  { %422 = vsyncadd [#allocation6], 4294966016  ;;  %v430_v0 = vmov 0.0   ;;  %vm431_vm0 = vmmov 0   ;;  %v321_v1 = vld [vmem:[#allocation5] sm:$0xff]   ;;  %v322_v2 = vld [vmem:[#allocation5 + $0x8] sm:$0xff]  }
  0x37   :  { %285 = vmatprep.subr.bf16.mxu0 %v430_v0  ;;  %289 = vmatprep.mubr.msk.bf16.mxu0 %vm431_vm0, %v430_v0  ;;  %v61_v3 = vld [vmem:[#allocation2] sm:$0xff]  ;;  %v323_v4 = vld [vmem:[#allocation7] sm:$0xff]   ;;  %vm86_vm1 = vcmask 261120   ;;  %v325_v7 = vld [vmem:[#allocation7 + $0x10] sm:$0xff]   ;;  %s432_s7 = smov [#allocation8]  }
  0x38   :  { %293 = vmatprep.subr.bf16.mxu1 %v430_v0  ;;  %309 = vmatprep.mubr.msk.bf16.mxu1 %vm431_vm0, %v430_v0  ;;  %v62_v5 = vpack.c.bf16 %v61_v3, %v61_v3  ;;  %v324_v6 = vld [vmem:[#allocation7 + $0x8] sm:$0xff]   ;;  %v326_v8 = vld [vmem:[#allocation7 + $0x18] sm:$0xff]   ;;  %v327_v9 = vld [vmem:[#allocation7 + $0x20] sm:$0xff]   ;;  %s250_s8 = sshll.u32 %s432_s7, 4  ;;  %s251_s8 = int_to_ptr.vmem [resolvable:$true] %s250_s8 }
  0x39   :  { %286 = vmatpush3.bf16.msra.mxu0 %v321_v1  ;;  %294 = vmatpush3.bf16.msra.mxu1 %v323_v4  ;;  %v328_v10 = vld [vmem:[#allocation7 + $0x28] sm:$0xff]   ;;  %v329_v11 = vld [vmem:[#allocation7 + $0x30] sm:$0xff]   ;;  %v330_v12 = vld [vmem:[#allocation7 + $0x38] sm:$0xff]   ;;  %p402_p11 = scmp.lt.s32.totalorder %s251_s8, %s251_s8 }
  0x3a   :  { %287 = vmatprep.subr.bf16.mxu0 %v430_v0  ;;  %295 = vmatprep.subr.bf16.mxu1 %v430_v0  ;;  %v260_v13 = vld [vmem:[%s525_s2] ss:$0 sm:$0xff]  ;;  %s397_s2 = scalar_lea.vmem %s251_s8, 128 }
  0x3b   :  { %v264_v21 = vld [vmem:[%s527_s4] ss:$0 sm:$0xff]  ;;  %p398_p10 = scmp.ne.s32.totalorder %s251_s8, %s397_s2  ;;  %p403_p12 = scmp.lt.s32.totalorder %s397_s2, %s397_s2 }
  0x3d   :  { %288 = vmatpush3.bf16.msra.mxu0 %v322_v2  ;;  %296 = vmatpush3.bf16.msra.mxu1 %v324_v6  ;;  %p404_p13 = por %p403_p12, %p402_p11 }
  0x3e   :  { %297 = vmatprep.subr.bf16.mxu1 %v430_v0 }
  0x3f   :  { %p405_p0 = pnand %p404_p13, %p398_p10 }
  0x40   :  { %290 = vmatmul.mubr.msk.bf16.vlgmr.msra.gmra.mrb[0].mxu0 %vm86_vm1, %v62_v5 }
  0x41   :  { %298 = vmatpush3.bf16.msra.mxu1 %v325_v7 }
  0x42   :  { %299 = vmatprep.subr.bf16.mxu1 %v430_v0 }
  0x45   :  { %300 = vmatpush3.bf16.msra.mxu1 %v326_v8 }
  0x46   :  { %301 = vmatprep.subr.bf16.mxu1 %v430_v0 }
  0x49   :  { %302 = vmatpush3.bf16.msra.mxu1 %v327_v9 }
  0x4a   :  { %303 = vmatprep.subr.bf16.mxu1 %v430_v0 }
  0x4d   :  { %304 = vmatpush3.bf16.msra.mxu1 %v328_v10 }
  0x4e   :  { %305 = vmatprep.subr.bf16.mxu1 %v430_v0 }
  0x51   :  { %306 = vmatpush3.bf16.msra.mxu1 %v329_v11 }
  0x52   :  { %307 = vmatprep.subr.bf16.mxu1 %v430_v0 }
  0x55   :  { %308 = vmatpush3.bf16.msra.mxu1 %v330_v12 }
 0x113   :  { %v124_v14 = vpop.f32.mrb[0].mxu0 }
 0x114   :  { %v125_v15 = vadd.f32 %v260_v13, %v124_v14  ;;  %v291_v16 = vpop.f32.mrb[1].mxu0 }
 0x115   :  { %v127_v17 = vpop.f32.mrb[2].mxu0 }
 0x116   :  { %v130_v18 = vmax.f32 %v125_v15, 0.0  ;;  %v292_v19 = vpop.f32.mrb[3].mxu0 }
 0x118   :  { %v131_v20 = vpack.c.bf16 %v130_v18, %v130_v18 }
 0x11a   :  { %310 = vmatmul.mubr.bf16.vlgmr.msra.gmra.mrb[0].mxu1 %v131_v20 }
 0x1ed   :  { %v237_v22 = vpop.f32.mrb[0].mxu1 }
 0x1ee   :  { %v238_v23 = vadd.f32 %v264_v21, %v237_v22  ;;  %v311_v24 = vpop.f32.mrb[1].mxu1 }
 0x1ef   :  { %v240_v25 = vpop.f32.mrb[2].mxu1 }
 0x1f0   :  { %243 = vst [vmem:[#allocation8] sm:$0xff] %v238_v23  ;;  %v312_v26 = vpop.f32.mrb[3].mxu1 }
 0x1f1   :  { %408 = shalt.err (!%p405_p0)
}
 0x1f2   :  { %s409_s4 = scalar_lea.hbm %s528_s5, 128 }
 0x1f3   :  { %p410_p1 = scmp.ne.s32.totalorder %s528_s5, %s409_s4  ;;  %p413_p2 = scmp.lt.u32.totalorder %s409_s4, %s528_s5 }
 0x1f5   :  { %p415_p3 = pnand %p413_p2, %p410_p1 }
 0x1f7   :  { %418 = shalt.err (!%p415_p3)
}
 0x1f8   :  { %253 = dma.vmem_to_hbm [thread:$0]  %s251_s8, 128, %s528_s5, [#allocation4]  }
 0x1f9   :  { %423 = dma.done.wait [#allocation4], 128  }
 0x1fa   :  { %424 = vsyncadd [#allocation4], 4294967168 }
 0x1fb   :  { %257 = vsyncpa [#allocation3], 1 }
 0x1fc   :  { %258 = vsyncpa [#allocation6], 1 }
 0x1fd   :  { %259 = vsyncpa [#allocation4], 1 }

</bundles_post_ra>
